<compile_context>
chip_gen: v5e
topology: v5e:2x2
jax: 0.10.0
libtpu: 0.0.40
codegen_flags: <defaults>
</compile_context>

<pallas_src>
import jax
import jax.numpy as jnp
from jax import lax
from jax.experimental import pallas as pl
from jax.experimental.pallas import tpu as pltpu


def _round_up(x, m):
    return (x + m - 1) // m * m


def _cond_linear_kernel(x_ref, w_ref, b_ref, e_ref, y_ref, o_ref):
    # x_ref: (TB, K)          activation tile (f32 or bf16)
    # w_ref: (K, N_pad)       pre-transposed Linear weight, VMEM-resident
    # b_ref: (1, N_pad)       f32 bias, VMEM-resident
    # e_ref: (n_steps, N_pad) f32 embedding table, VMEM-resident
    # y_ref: (TB, 1)          i32 timestep indices for this batch tile
    # o_ref: (TB, N_pad)      f32 output tile
    out = jnp.dot(x_ref[...], w_ref[...], preferred_element_type=jnp.float32)
    out = out + b_ref[...]

    # In-kernel embedding lookup: gamma = E[y] as a one-hot MXU matmul
    # (n_steps is tiny; one-hot selection is exact in f32).  No HBM traffic
    # for gamma and no data-dependent gather.
    y = y_ref[...]                                                  # (TB, 1)
    n_steps = e_ref.shape[0]
    steps = lax.broadcasted_iota(jnp.int32, (y.shape[0], n_steps), 1)
    onehot = (y == steps).astype(jnp.float32)                       # (TB, n_steps)
    gamma = jnp.dot(onehot, e_ref[...], preferred_element_type=jnp.float32)
    # TODO(synk): if num_in grows MXU-bound (K >~ 1-2k), replace this one-hot
    # matmul with n_steps VPU select-accumulates to keep gamma off the MXU.

    o_ref[...] = (gamma * out).astype(o_ref.dtype)


def prepare_params(lin_weight, lin_bias, embed_weight, *, param_dtype=jnp.float32):
    """One-time parameter prep (pad num_out to 128 lanes, transpose W).

    Call this once at module init; do NOT call it per forward.
    lin_weight:   (num_out, num_in)  PyTorch Linear layout
    lin_bias:     (num_out,)
    embed_weight: (n_steps, num_out)
    """
    num_out, num_in = lin_weight.shape
    n_steps = embed_weight.shape[0]
    n_pad = _round_up(num_out, 128)
    if n_pad != num_out:
        lin_weight = jnp.pad(lin_weight, ((0, n_pad - num_out), (0, 0)))
        lin_bias = jnp.pad(lin_bias, ((0, n_pad - num_out),))
        embed_weight = jnp.pad(embed_weight, ((0, 0), (0, n_pad - num_out)))
    return dict(
        w_t=jnp.asarray(lin_weight.T, dtype=param_dtype),    # (num_in, n_pad)
        b2=lin_bias.reshape(1, n_pad).astype(jnp.float32),   # (1, n_pad)
        e2=embed_weight.astype(jnp.float32),                 # (n_steps, n_pad)
        num_in=num_in, num_out=num_out, n_pad=n_pad, n_steps=n_steps,
    )


def _resident_spec(shape):
    """BlockSpec for an operand that is identical on every grid step."""
    zeros = (0,) * len(shape)
    try:
        # Single-buffer: never re-fetched, so double buffering only burns VMEM.
        return pl.BlockSpec(shape, lambda i: zeros, pipeline_mode=pl.Buffered(1))
    except TypeError:
        return pl.BlockSpec(shape, lambda i: zeros)


def conditional_linear(x, y, params, *, block_b=512, slice_output=True):
    """Pallas ConditionalLinear.forward.

    x: (B, num_in) float32 (cast to params' dtype at the HBM boundary)
    y: (B,) int32 timestep indices
    params: output of prepare_params()
    returns (B, num_out) f32 if slice_output else padded (b_pad, n_pad) f32.
    """
    B, num_in = x.shape
    assert num_in == params["num_in"]
    w_t, b2, e2 = params["w_t"], params["b2"], params["e2"]
    n_pad, n_steps, num_out = params["n_pad"], params["n_steps"], params["num_out"]

    # bf16 opt-in: cast activations once at the HBM boundary to match W.
    if x.dtype != w_t.dtype:
        x = x.astype(w_t.dtype)

    # Balanced batch tiling: cover B in ceil(B/block_b) sublane-aligned tiles.
    n_tiles = max(1, pl.cdiv(B, block_b))
    tb = min(_round_up(pl.cdiv(B, n_tiles), 8), _round_up(B, 8))
    b_pad = _round_up(B, tb)
    if b_pad != B:
        # Padded rows use x=0 and y=0 (a valid index); sliced away below.
        x = jnp.pad(x, ((0, b_pad - B), (0, 0)))
        y = jnp.pad(y, ((0, b_pad - B),))
    y2 = y.reshape(b_pad, 1).astype(jnp.int32)

    act_bytes = jnp.dtype(x.dtype).itemsize
    w_bytes = num_in * n_pad * jnp.dtype(w_t.dtype).itemsize
    param_bytes = w_bytes + n_pad * 4 + n_steps * n_pad * 4
    cost = pl.CostEstimate(
        flops=2 * b_pad * num_in * n_pad + 2 * b_pad * n_steps * n_pad,
        transcendentals=0,
        bytes_accessed=b_pad * num_in * act_bytes + b_pad * 4
        + b_pad * n_pad * 4 + param_bytes,
    )

    # VMEM budget: double-buffered x / y / out tiles + single-buffered params,
    # with 2x headroom, clamped to v7x's 64 MiB physical VMEM.
    block_bytes = tb * num_in * act_bytes + tb * 4 + tb * n_pad * 4
    working = 2 * block_bytes + param_bytes
    vmem_limit = int(min(max(2 * working + (4 << 20), 16 << 20), 64 << 20))

    out = pl.pallas_call(
        _cond_linear_kernel,
        out_shape=jax.ShapeDtypeStruct((b_pad, n_pad), jnp.float32),
        grid=(b_pad // tb,),
        in_specs=[
            pl.BlockSpec((tb, num_in), lambda i: (i, 0)),   # x: tiled over batch
            _resident_spec((num_in, n_pad)),                # W^T: VMEM-resident
            _resident_spec((1, n_pad)),                     # bias: resident
            _resident_spec((n_steps, n_pad)),               # embedding: resident
            pl.BlockSpec((tb, 1), lambda i: (i, 0)),        # y: tiled over batch
        ],
        out_specs=pl.BlockSpec((tb, n_pad), lambda i: (i, 0)),
        compiler_params=pltpu.CompilerParams(
            dimension_semantics=("parallel",),   # batch tiles are independent
            vmem_limit_bytes=vmem_limit,
        ),
        cost_estimate=cost,
    )(x, w_t, b2, e2, y2)

    if slice_output:
        out = out[:B, :num_out]
    return out


def reference(x, y, lin_weight, lin_bias, embed_weight):
    out = x @ lin_weight.T + lin_bias
    gamma = embed_weight[y]
    return gamma * out


if __name__ == "__main__":
    key = jax.random.PRNGKey(0)
    k_x, k_y, k_w, k_b, k_e = jax.random.split(key, 5)

    B, num_in, num_out, n_steps = 8, 32, 16, 10

    x = jax.random.normal(k_x, (B, num_in), dtype=jnp.float32)
    y = jax.random.randint(k_y, (B,), 0, n_steps, dtype=jnp.int32)

    # nn.Linear default init: U(-1/sqrt(num_in), 1/sqrt(num_in)).
    bound = 1.0 / (num_in ** 0.5)
    lin_weight = jax.random.uniform(k_w, (num_out, num_in), jnp.float32,
                                    minval=-bound, maxval=bound)
    lin_bias = jax.random.uniform(k_b, (num_out,), jnp.float32,
                                  minval=-bound, maxval=bound)
    # embed.weight.data.uniform_() -> U[0, 1)
    embed_weight = jax.random.uniform(k_e, (n_steps, num_out), jnp.float32)

    params = prepare_params(lin_weight, lin_bias, embed_weight)  # once, at init
    out = conditional_linear(x, y, params)
    out = jax.block_until_ready(out)

    ref = reference(x, y, lin_weight, lin_bias, embed_weight)
    assert out.shape == (B, num_out)
    assert jnp.allclose(out, ref, atol=1e-5, rtol=1e-5), "mismatch vs reference"

    print("KERNEL_OK")
</pallas_src>

<mosaic_0001>
module attributes {stable_mosaic.version = 11 : i64} {
  func.func @_cond_linear_kernel(%arg0: i32, %arg1: memref<8x32xf32, #tpu.memory_space<vmem>>, %arg2: memref<32x128xf32, #tpu.memory_space<vmem>>, %arg3: memref<1x128xf32, #tpu.memory_space<vmem>>, %arg4: memref<10x128xf32, #tpu.memory_space<vmem>>, %arg5: memref<8x1xi32, #tpu.memory_space<vmem>>, %arg6: memref<8x128xf32, #tpu.memory_space<vmem>>) attributes {dimension_semantics = [#tpu.dimension_semantics<parallel>], iteration_bounds = array<i64: 1>, scalar_prefetch = 0 : i64, scratch_operands = 0 : i64, tpu.core_type = #tpu.core_type<tc>, window_params = [{transform_indices = @transform_0, window_bounds = array<i64: 8, 32>}, {pipeline_mode = #tpu.pipeline_mode<synchronous>, transform_indices = @transform_1, window_bounds = array<i64: 32, 128>}, {pipeline_mode = #tpu.pipeline_mode<synchronous>, transform_indices = @transform_2, window_bounds = array<i64: 1, 128>}, {pipeline_mode = #tpu.pipeline_mode<synchronous>, transform_indices = @transform_3, window_bounds = array<i64: 10, 128>}, {transform_indices = @transform_4, window_bounds = array<i64: 8, 1>}, {transform_indices = @transform_5, window_bounds = array<i64: 8, 128>}]} {
    %c0 = arith.constant 0 : index
    %c0_0 = arith.constant 0 : index
    %0 = vector.load %arg1[%c0, %c0_0] : memref<8x32xf32, #tpu.memory_space<vmem>>, vector<8x32xf32>
    %c0_1 = arith.constant 0 : index
    %c0_2 = arith.constant 0 : index
    %1 = vector.load %arg2[%c0_1, %c0_2] : memref<32x128xf32, #tpu.memory_space<vmem>>, vector<32x128xf32>
    %cst = arith.constant dense<0.000000e+00> : vector<8x128xf32>
    %2 = tpu.matmul %0, %1, %cst {dimension_numbers = #tpu.dot_dimension_numbers<[1], [0], [0], [1], [0, 0, 1, 1], [], []>} : vector<8x32xf32>, vector<32x128xf32>, vector<8x128xf32> -> vector<8x128xf32>
    %c0_3 = arith.constant 0 : index
    %c0_4 = arith.constant 0 : index
    %3 = vector.load %arg3[%c0_3, %c0_4] : memref<1x128xf32, #tpu.memory_space<vmem>>, vector<1x128xf32>
    %4 = vector.broadcast %3 : vector<1x128xf32> to vector<8x128xf32>
    %5 = arith.addf %2, %4 : vector<8x128xf32>
    %c0_5 = arith.constant 0 : index
    %c0_6 = arith.constant 0 : index
    %6 = vector.load %arg5[%c0_5, %c0_6] : memref<8x1xi32, #tpu.memory_space<vmem>>, vector<8x1xi32>
    %7 = tpu.iota {dimensions = array<i32: 1>} : vector<8x10xi32>
    %8 = vector.broadcast %6 : vector<8x1xi32> to vector<8x10xi32>
    %9 = arith.cmpi eq, %8, %7 : vector<8x10xi32>
    %10 = arith.extui %9 : vector<8x10xi1> to vector<8x10xi32>
    %11 = arith.sitofp %10 : vector<8x10xi32> to vector<8x10xf32>
    %c0_7 = arith.constant 0 : index
    %c0_8 = arith.constant 0 : index
    %12 = vector.load %arg4[%c0_7, %c0_8] : memref<10x128xf32, #tpu.memory_space<vmem>>, vector<10x128xf32>
    %cst_9 = arith.constant dense<0.000000e+00> : vector<8x128xf32>
    %13 = tpu.matmul %11, %12, %cst_9 {dimension_numbers = #tpu.dot_dimension_numbers<[1], [0], [0], [1], [0, 0, 1, 1], [], []>} : vector<8x10xf32>, vector<10x128xf32>, vector<8x128xf32> -> vector<8x128xf32>
    %14 = arith.mulf %13, %5 : vector<8x128xf32>
    %c0_10 = arith.constant 0 : index
    %c0_11 = arith.constant 0 : index
    %15 = vector.load %arg6[%c0_10, %c0_11] : memref<8x128xf32, #tpu.memory_space<vmem>>, vector<8x128xf32>
    tpu.vector_store %arg6[%c0_10, %c0_11], %14 {strides = array<i32>} : memref<8x128xf32, #tpu.memory_space<vmem>>, vector<8x128xf32>,
    return
  }
  func.func @transform_0(%arg0: i32) -> (i32, i32) {
    %c0_i32 = arith.constant 0 : i32
    %c0_i32_0 = arith.constant 0 : i32
    return %arg0, %c0_i32 : i32, i32
  }
  func.func @transform_1(%arg0: i32) -> (i32, i32) {
    %c0_i32 = arith.constant 0 : i32
    %c0_i32_0 = arith.constant 0 : i32
    %c0_i32_1 = arith.constant 0 : i32
    return %c0_i32, %c0_i32_0 : i32, i32
  }
  func.func @transform_2(%arg0: i32) -> (i32, i32) {
    %c0_i32 = arith.constant 0 : i32
    %c0_i32_0 = arith.constant 0 : i32
    %c0_i32_1 = arith.constant 0 : i32
    return %c0_i32, %c0_i32_0 : i32, i32
  }
  func.func @transform_3(%arg0: i32) -> (i32, i32) {
    %c0_i32 = arith.constant 0 : i32
    %c0_i32_0 = arith.constant 0 : i32
    %c0_i32_1 = arith.constant 0 : i32
    return %c0_i32, %c0_i32_0 : i32, i32
  }
  func.func @transform_4(%arg0: i32) -> (i32, i32) {
    %c0_i32 = arith.constant 0 : i32
    %c0_i32_0 = arith.constant 0 : i32
    return %arg0, %c0_i32 : i32, i32
  }
  func.func @transform_5(%arg0: i32) -> (i32, i32) {
    %c0_i32 = arith.constant 0 : i32
    %c0_i32_0 = arith.constant 0 : i32
    return %arg0, %c0_i32 : i32, i32
  }
}

</mosaic_0001>

<bundles_post_ra>
// kernel: tpu_custom_call.1
= control target key start
LH: loop header
LB: loop body
LE: loop exit
PB: predicated region body
PF: predicated region fallthrough
CT: control target
= control target key end

     0   :  { %10 = vsyncpa [#allocation3], 0  ;;  %s291_s0 = inlined_call_operand.vmem [shape: f32[8,32], index: 0, kind: input, shape index: {}]   ;;  %s292_s1 = inlined_call_operand.hbm [shape: f32[32,128], index: 1, kind: input, shape index: {}]   ;;  %s293_s2 = inlined_call_operand.vmem [shape: f32[1,128], index: 2, kind: input, shape index: {}]   ;;  %s294_s3 = inlined_call_operand.hbm [shape: f32[10,128], index: 3, kind: input, shape index: {}]   ;;  %s295_s4 = inlined_call_operand.vmem [shape: s32[8,1], index: 4, kind: input, shape index: {}]   ;;  %s296_s5 = inlined_call_operand.hbm [shape: f32[8,128], index: 5, kind: output, shape index: {}]  }
   0x1   :  { %11 = vsyncpa [#allocation6], 0 }
   0x2   :  { %12 = vsyncpa [#allocation4], 0  ;;  %s19_s20 = sshll.u32 %s292_s1, 4  ;;  %s236_s21 = smov [#allocation2]   ;;  %s20_s20 = int_to_ptr.hbm [resolvable:$true] %s19_s20 }
   0x3   :  { %s21_s22 = sshll.u32 %s236_s21, 4  ;;  %s34_s25 = sshll.u32 %s294_s3, 4  ;;  %s22_s22 = int_to_ptr.vmem [resolvable:$true] %s21_s22  ;;  %s35_s25 = int_to_ptr.hbm [resolvable:$true] %s34_s25 }
   0x4   :  { %s237_s26 = smov 128   ;;  %s238_s27 = smov 8  }
   0x5   :  { %27 = dma.hbm_to_vmem [thread:$0]  %s20_s20, 512, %s22_s22, [#allocation3], %s237_s26, %s237_s26, %s238_s27  }
   0x6   :  { %s239_s28 = smov [#allocation5]  }
   0x7   :  { %s36_s29 = sshll.u32 %s239_s28, 4  ;;  %s37_s29 = int_to_ptr.vmem [resolvable:$true] %s36_s29 }
   0x8   :  { %42 = dma.hbm_to_vmem [thread:$0]  %s35_s25, 256, %s37_s29, [#allocation6], %s237_s26, %s237_s26, %s238_s27  }
   0x9   :  { %230 = dma.done.wait [#allocation3], 512  }
   0xa   :  { %231 = vsyncadd [#allocation3], 4294966784 }
   0xb   :  { %232 = dma.done.wait [#allocation6], 256  }
   0xc   :  { %233 = vsyncadd [#allocation6], 4294967040  ;;  %v240_v0 = vmov 0   ;;  %vm101_vm0 = vcmask 1041408   ;;  %v86_v1 = vld [vmem:[%s295_s4] sm:$0xff]  ;;  %v57_v2 = vld [vmem:[#allocation2 + $0x18] sm:$0xff]  ;;  %v87_v9 = vlaneseq }
   0xd   :  { %156 = vset.pattern.permute.xlu0 %v240_v0  ;;  %v56_v3 = vld [vmem:[#allocation2 + $0x10] sm:$0xff]  ;;  %78 = vmatpush.msra.mxu0 %v57_v2  ;;  %v96_v4 = vld [vmem:[#allocation5 + $0x8] sm:$0x3]  ;;  %v54_v6 = vld [vmem:[#allocation2] sm:$0xff]  ;;  %vm62_vm1 = vcmask 261120   ;;  %vm97_vm2 = vcmask 80896  }
   0xe   :  { %90 = vperm.xlu0 %156, %v86_v1   ;;  %v55_v5 = vld [vmem:[#allocation2 + $0x8] sm:$0xff]  ;;  %147 = vmatpush.msk.msra.mxu1 %vm101_vm0, %v96_v4  ;;  %v53_v7 = vld [vmem:[%s291_s0] sm:$0xff]  ;;  %v88_v10 = vand.u32 127, %v87_v9  ;;  %v241_v12 = vmov 0.0   ;;  %s242_s8 = smov [#allocation7]   ;;  %s134_s11 = sshll.u32 %s296_s5, 4  ;;  %s135_s11 = int_to_ptr.hbm [resolvable:$true] %s134_s11 }
   0xf   :  { %79 = vmatpush.msra.mxu0 %v56_v3  ;;  %v95_v8 = vld [vmem:[#allocation5] sm:$0xff]  ;;  %s132_s0 = sshll.u32 %s242_s8, 4  ;;  %s133_s0 = int_to_ptr.vmem [resolvable:$true] %s132_s0 }
  0x10   :  { %120 = vmatpush.msra.mxu1 %v95_v8  ;;  %v157_v14 = vld [vmem:[%s293_s2] ss:$0 sm:$0xff] }
  0x11   :  { %80 = vmatpush.msra.mxu0 %v55_v5 }
  0x13   :  { %81 = vmatpush.msra.mxu0 %v54_v6 }
  0x14   :  { %145 = vmatmul.msk.f32.vlgmr.msra.gmra.mxu0 %vm62_vm1, %v53_v7 }
  0x80   :  { %v91_v11 = vpop.permute.xlu0 %90 }
  0x81   :  { %vm92_vm3 = vcmp.eq.s32.totalorder %v91_v11, %v88_v10 }
  0x82   :  { %v146_v13 = vsel %vm92_vm3, 1.0, %v241_v12 }
  0x83   :  { %148 = vmatmul.msk.f32.vlgmr.msra.gmra.mxu1 %vm97_vm2, %v146_v13 }
  0x91   :  { %v83_v15 = vpop.f32.mrf.mxu0 }
  0x92   :  { %v84_v16 = vadd.f32 %v157_v14, %v83_v15 }
 0x100   :  { %v122_v17 = vpop.f32.mrf.mxu1 }
 0x101   :  { %v125_v18 = vmul.f32 %v122_v17, %v84_v16 }
 0x103   :  { %126 = vst [vmem:[#allocation7] sm:$0xff] %v125_v18 }
 0x104   :  { %137 = dma.vmem_to_hbm [thread:$0]  %s133_s0, 128, %s135_s11, [#allocation4]  }
 0x105   :  { %234 = dma.done.wait [#allocation4], 128  }
 0x106   :  { %235 = vsyncadd [#allocation4], 4294967168 }
 0x107   :  { %142 = vsyncpa [#allocation3], 1 }
 0x108   :  { %143 = vsyncpa [#allocation6], 1 }
 0x109   :  { %144 = vsyncpa [#allocation4], 1 }

</bundles_post_ra>
